<compile_context>
chip_gen: v6e
topology: v6e:2x2x1
jax: 0.10.0
libtpu: 0.0.40
codegen_flags: <defaults>
</compile_context>

<pallas_src>
import functools

import jax
import jax.numpy as jnp
from jax import lax
from jax.experimental import pallas as pl
from jax.experimental.pallas import tpu as pltpu


def _round_up(x, m):
    return ((x + m - 1) // m) * m


def _sublane_multiple(dtype):
    # f32 -> 8, bf16 -> 16, int8/fp8 -> 32 (packed sublanes).
    return max(8, 32 // jnp.dtype(dtype).itemsize)


# --------------------------------------------------------------------------
# Kernels.  All of them consume the weight pre-transposed to (fin, fout), so
# the contraction is the MXU-native NN form (no in-kernel transpose).
# --------------------------------------------------------------------------

def _single_block_kernel(x_ref, wt_ref, o_ref, *, precision):
    # Whole problem resident in VMEM: (M, K) @ (K, N) -> (M, N).
    o_ref[...] = jnp.dot(
        x_ref[...], wt_ref[...],
        preferred_element_type=jnp.float32,
        precision=precision,
    ).astype(o_ref.dtype)


def _tiled_kernel_nok(x_ref, wt_ref, o_ref, *, precision):
    # Full K per grid point: (tm, K) @ (K, tn) -> (tm, tn).  No accumulator.
    o_ref[...] = jnp.dot(
        x_ref[...], wt_ref[...],
        preferred_element_type=jnp.float32,
        precision=precision,
    ).astype(o_ref.dtype)


def _tiled_kernel_ksplit_f32(x_ref, wt_ref, o_ref, *, precision):
    # f32 output: accumulate directly into the (K-resident) output block.
    @pl.when(pl.program_id(2) == 0)
    def _():
        o_ref[...] = jnp.zeros_like(o_ref)

    o_ref[...] += jnp.dot(
        x_ref[...], wt_ref[...],
        preferred_element_type=jnp.float32,
        precision=precision,
    )


def _tiled_kernel_ksplit_acc(x_ref, wt_ref, o_ref, acc_ref, *, precision):
    # Narrow output dtype: keep an f32 VMEM accumulator, cast once at the end.
    k = pl.program_id(2)

    @pl.when(k == 0)
    def _():
        acc_ref[...] = jnp.zeros_like(acc_ref)

    acc_ref[...] += jnp.dot(
        x_ref[...], wt_ref[...],
        preferred_element_type=jnp.float32,
        precision=precision,
    )

    @pl.when(k == pl.num_programs(2) - 1)
    def _():
        o_ref[...] = acc_ref[...].astype(o_ref.dtype)


# --------------------------------------------------------------------------
# Wrapper
# --------------------------------------------------------------------------

def embedding_forward(x, weight, *, weight_transposed=False,
                      tm=None, tn=None, tk=None, precision=None):
    """y = x @ W.T (== nn.Linear(fin, fout, bias=False).forward).

    x:      (..., fin)
    weight: (fout, fin) PyTorch layout, or (fin, fout) if weight_transposed=True.
            Pre-transposing (and pre-casting) the weight once at parameter
            setup time is the intended usage; passing the raw PyTorch layout
            still works but pays a one-time transpose per call.
    precision: forwarded to the MXU dot; pass lax.Precision.HIGHEST for strict
            f32 parity with PyTorch on large fin.
    """
    fin = x.shape[-1]
    if weight_transposed:
        fin_w, fout = weight.shape
        w_t = weight
    else:
        fout, fin_w = weight.shape
        # One-time layout change; hoist to parameter setup in real use.
        w_t = weight.T
    assert fin_w == fin, f"weight shape {weight.shape} incompatible with fin={fin}"

    lead = x.shape[:-1]
    M = 1
    for d in lead:
        M *= d
    x2 = x.reshape(M, fin)

    out_dtype = x2.dtype
    if w_t.dtype != out_dtype:
        # NOTE: hoist this cast to parameter setup in real use (per-call HBM RTT).
        w_t = w_t.astype(out_dtype)

    itemsize = jnp.dtype(out_dtype).itemsize

    # ---------------- fast path: whole problem in one VMEM block -------------
    small_bytes = (M * fin + fin * fout + M * fout) * max(itemsize, 4)
    if small_bytes <= 4 * 1024 * 1024 and tm is None and tn is None and tk is None:
        out = pl.pallas_call(
            functools.partial(_single_block_kernel, precision=precision),
            out_shape=jax.ShapeDtypeStruct((M, fout), out_dtype),
            in_specs=[pl.BlockSpec(memory_space=pltpu.MemorySpace.VMEM),
                      pl.BlockSpec(memory_space=pltpu.MemorySpace.VMEM)],
            out_specs=pl.BlockSpec(memory_space=pltpu.MemorySpace.VMEM),
            cost_estimate=pl.CostEstimate(
                flops=2 * M * fin * fout,
                transcendentals=0,
                bytes_accessed=small_bytes,
            ),
        )(x2, w_t)
        return out.reshape(*lead, fout)

    # ---------------- general tiled path -------------------------------------
    sub = _sublane_multiple(out_dtype)
    if tm is None:
        tm = min(512, _round_up(M, sub))
    if tn is None:
        tn = fout if fout <= 512 else 512      # full dim or 128-multiple tile
    if tk is None:
        tk = fin if fin <= 2048 else 1024      # keep full K resident when it fits

    grid_m = pl.cdiv(M, tm)
    grid_n = pl.cdiv(fout, tn)

    k_split = tk < fin
    scratch = []
    if k_split:
        # Only the contraction dim needs explicit zero padding (garbage K
        # columns would corrupt real outputs); M/N edge blocks are handled by
        # the cdiv grid with masked out-of-bounds stores.
        K_p = _round_up(fin, tk)
        if K_p != fin:
            x2 = jnp.pad(x2, ((0, 0), (0, K_p - fin)))
            w_t = jnp.pad(w_t, ((0, K_p - fin), (0, 0)))
        grid = (grid_m, grid_n, K_p // tk)
        dims = ("parallel", "parallel", "arbitrary")
        in_specs = [pl.BlockSpec((tm, tk), lambda i, j, k: (i, k)),
                    pl.BlockSpec((tk, tn), lambda i, j, k: (k, j))]
        out_spec = pl.BlockSpec((tm, tn), lambda i, j, k: (i, j))
        if jnp.dtype(out_dtype) == jnp.dtype(jnp.float32):
            kernel = functools.partial(_tiled_kernel_ksplit_f32, precision=precision)
        else:
            kernel = functools.partial(_tiled_kernel_ksplit_acc, precision=precision)
            scratch = [pltpu.VMEM((tm, tn), jnp.float32)]
    else:
        tk = fin
        grid = (grid_m, grid_n)
        dims = ("parallel", "parallel")
        in_specs = [pl.BlockSpec((tm, tk), lambda i, j: (i, 0)),
                    pl.BlockSpec((tk, tn), lambda i, j: (0, j))]
        out_spec = pl.BlockSpec((tm, tn), lambda i, j: (i, j))
        kernel = functools.partial(_tiled_kernel_nok, precision=precision)

    # Double-buffered tile footprint (+ accumulator) with headroom, capped at
    # 48 MiB so v7x (64 MiB physical per TC) keeps slack for Mosaic internals.
    footprint = 2 * (tm * tk + tk * tn + tm * tn) * itemsize
    if scratch:
        footprint += tm * tn * 4
    vmem_limit = min(max(2 * footprint, 16 * 1024 * 1024), 48 * 1024 * 1024)

    cost = pl.CostEstimate(
        flops=2 * M * fin * fout,
        transcendentals=0,
        # Account for re-reads: x streamed once per N block, W once per M block.
        bytes_accessed=(M * fin * grid_n + fout * fin * grid_m + M * fout) * itemsize,
    )

    out = pl.pallas_call(
        kernel,
        out_shape=jax.ShapeDtypeStruct((M, fout), out_dtype),
        grid_spec=pltpu.PrefetchScalarGridSpec(
            num_scalar_prefetch=0,
            grid=grid,
            in_specs=in_specs,
            out_specs=out_spec,
            scratch_shapes=scratch,
        ),
        compiler_params=pltpu.CompilerParams(
            dimension_semantics=dims,
            vmem_limit_bytes=vmem_limit,
        ),
        cost_estimate=cost,
    )(x2, w_t)

    return out.reshape(*lead, fout)


if __name__ == "__main__":
    # Small shapes consistent with the module: batch=2, nodes/seq=16, fin=32, fout=64
    fin, fout = 32, 64
    B, S = 2, 16

    key = jax.random.PRNGKey(0)
    kx, kw = jax.random.split(key)

    # Deterministic param init mimicking nn.Linear default: U(-1/sqrt(fin), 1/sqrt(fin))
    bound = 1.0 / (fin ** 0.5)
    weight = jax.random.uniform(kw, (fout, fin), jnp.float32, -bound, bound)

    # One-time parameter setup: store the weight pre-transposed to (fin, fout)
    # so the forward path never transposes or casts per call.
    w_t = jnp.asarray(weight.T)

    x = jax.random.normal(kx, (B, S, fin), jnp.float32)

    y = embedding_forward(x, w_t, weight_transposed=True)
    y = jax.block_until_ready(y)

    # Reference check against plain JAX (== PyTorch F.linear semantics, no bias)
    y_ref = x @ weight.T
    assert y.shape == (B, S, fout), y.shape
    assert jnp.allclose(y, y_ref, atol=1e-5, rtol=1e-5)

    print("KERNEL_OK")
</pallas_src>

<mosaic_0001>
module attributes {stable_mosaic.version = 11 : i64} {
  func.func @_single_block_kernel(%arg0: memref<32x32xf32, #tpu.memory_space<vmem>>, %arg1: memref<32x64xf32, #tpu.memory_space<vmem>>, %arg2: memref<32x64xf32, #tpu.memory_space<vmem>>) attributes {dimension_semantics = [], scalar_prefetch = 0 : i64, scratch_operands = 0 : i64, tpu.core_type = #tpu.core_type<tc>} {
    %c0 = arith.constant 0 : index
    %c0_0 = arith.constant 0 : index
    %0 = vector.load %arg0[%c0, %c0_0] : memref<32x32xf32, #tpu.memory_space<vmem>>, vector<32x32xf32>
    %c0_1 = arith.constant 0 : index
    %c0_2 = arith.constant 0 : index
    %1 = vector.load %arg1[%c0_1, %c0_2] : memref<32x64xf32, #tpu.memory_space<vmem>>, vector<32x64xf32>
    %cst = arith.constant dense<0.000000e+00> : vector<32x64xf32>
    %2 = tpu.matmul %0, %1, %cst {dimension_numbers = #tpu.dot_dimension_numbers<[1], [0], [0], [1], [0, 0, 1, 1], [], []>} : vector<32x32xf32>, vector<32x64xf32>, vector<32x64xf32> -> vector<32x64xf32>
    %c0_3 = arith.constant 0 : index
    %c0_4 = arith.constant 0 : index
    %3 = vector.load %arg2[%c0_3, %c0_4] : memref<32x64xf32, #tpu.memory_space<vmem>>, vector<32x64xf32>
    tpu.vector_store %arg2[%c0_3, %c0_4], %2 {strides = array<i32>} : memref<32x64xf32, #tpu.memory_space<vmem>>, vector<32x64xf32>,
    return
  }
}

</mosaic_0001>

<bundles_post_ra>
// kernel: tpu_custom_call.1
= control target key start
LH: loop header
LB: loop body
LE: loop exit
PB: predicated region body
PF: predicated region fallthrough
CT: control target
= control target key end

     0   :  { %7 = vsyncpa [#allocation3], 0  ;;  %s312_s0 = inlined_call_operand.hbm [shape: f32[32,32], index: 0, kind: input, shape index: {}]   ;;  %s313_s1 = inlined_call_operand.hbm [shape: f32[32,64], index: 1, kind: input, shape index: {}]   ;;  %s314_s2 = inlined_call_operand.hbm [shape: f32[32,64], index: 2, kind: output, shape index: {}]  }
   0x1   :  { %8 = vsyncpa [#allocation6], 0 }
   0x2   :  { %9 = vsyncpa [#allocation4], 0  ;;  %s274_s9 = smov [#allocation2]  }
   0x3   :  { %s15_s10 = sshll.u32 %s274_s9, 4  ;;  %s16_s10 = int_to_ptr.vmem [resolvable:$true] %s15_s10 }
   0x4   :  { %s216_s11 = scalar_lea.vmem %s16_s10, 512  ;;  %p221_p1 = scmp.lt.s32.totalorder %s16_s10, %s16_s10 }
   0x5   :  { %p217_p0 = scmp.ne.s32.totalorder %s16_s10, %s216_s11  ;;  %p222_p2 = scmp.lt.s32.totalorder %s216_s11, %s216_s11 }
   0x7   :  { %p223_p3 = por %p222_p2, %p221_p1 }
   0x9   :  { %p224_p4 = pnand %p223_p3, %p217_p0 }
   0xb   :  { %227 = shalt.err (!%p224_p4)
}
   0xc   :  { %s275_s12 = smov 128   ;;  %s276_s13 = smov 8  }
   0xd   :  { %21 = dma.hbm_to_vmem [thread:$0]  %s312_s0, 512, %s16_s10, [#allocation3], %s275_s12, %s275_s12, %s276_s13  }
   0xe   :  { %s277_s16 = smov [#allocation5]  }
   0xf   :  { %s27_s17 = sshll.u32 %s277_s16, 4  ;;  %s28_s17 = int_to_ptr.vmem [resolvable:$true] %s27_s17 }
  0x10   :  { %s236_s18 = scalar_lea.vmem %s28_s17, 512  ;;  %p241_p6 = scmp.lt.s32.totalorder %s28_s17, %s28_s17 }
  0x11   :  { %p237_p5 = scmp.ne.s32.totalorder %s28_s17, %s236_s18  ;;  %p242_p7 = scmp.lt.s32.totalorder %s236_s18, %s236_s18 }
  0x13   :  { %p243_p8 = por %p242_p7, %p241_p6 }
  0x15   :  { %p244_p9 = pnand %p243_p8, %p237_p5 }
  0x17   :  { %247 = shalt.err (!%p244_p9)
}
  0x18   :  { %33 = dma.hbm_to_vmem [thread:$0]  %s313_s1, 512, %s28_s17, [#allocation6], %s275_s12, %s275_s12, %s276_s13  }
  0x19   :  { %268 = dma.done.wait [#allocation3], 512  }
  0x1a   :  { %269 = vsyncadd [#allocation3], 4294966784 }
  0x1b   :  { %270 = dma.done.wait [#allocation6], 512  }
  0x1c   :  { %271 = vsyncadd [#allocation6], 4294966784  ;;  %v47_v0 = vld [vmem:[#allocation5 + $0x18] sm:$0xff]  ;;  %v46_v1 = vld [vmem:[#allocation5 + $0x10] sm:$0xff]  ;;  %vm48_vm0 = vcmask 261120   ;;  %vm146_vm1 = vcmask 523264  }
  0x1d   :  { %181 = vmatprep.subr.mxu0 %v47_v0  ;;  %195 = vmatprep.subr.mxu1 %v47_v0  ;;  %v45_v2 = vld [vmem:[#allocation5 + $0x8] sm:$0xff]  ;;  %v44_v3 = vld [vmem:[#allocation5] sm:$0xff]  ;;  %v42_v5 = vld [vmem:[#allocation2 + $0x10] sm:$0xff]  ;;  %s278_s0 = smov [#allocation7]  }
  0x1e   :  { %182 = vmatpush3.msra.mxu0 %v47_v0  ;;  %199 = vmatpush3.msra.mxu1 %v47_v0  ;;  %v40_v4 = vld [vmem:[#allocation2] sm:$0xff]  ;;  %v41_v6 = vld [vmem:[#allocation2 + $0x8] sm:$0xff]  ;;  %v43_v7 = vld [vmem:[#allocation2 + $0x18] sm:$0xff]  ;;  %s156_s1 = sshll.u32 %s278_s0, 4  ;;  %s157_s1 = int_to_ptr.vmem [resolvable:$true] %s156_s1 }
  0x1f   :  { %183 = vmatprep.subr.mxu0 %v46_v1  ;;  %196 = vmatprep.subr.mxu1 %v46_v1  ;;  %s248_s21 = scalar_lea.vmem %s157_s1, 512  ;;  %p253_p11 = scmp.lt.s32.totalorder %s157_s1, %s157_s1 }
  0x20   :  { %184 = vmatpush3.msra.mxu0 %v46_v1  ;;  %200 = vmatpush3.msra.mxu1 %v46_v1  ;;  %p249_p10 = scmp.ne.s32.totalorder %s157_s1, %s248_s21  ;;  %p254_p12 = scmp.lt.s32.totalorder %s248_s21, %s248_s21 }
  0x21   :  { %185 = vmatprep.subr.mxu0 %v45_v2  ;;  %197 = vmatprep.subr.mxu1 %v45_v2 }
  0x22   :  { %186 = vmatpush3.msra.mxu0 %v45_v2  ;;  %201 = vmatpush3.msra.mxu1 %v45_v2  ;;  %p255_p13 = por %p254_p12, %p253_p11 }
  0x23   :  { %187 = vmatprep.subr.mxu0 %v44_v3  ;;  %198 = vmatprep.subr.mxu1 %v44_v3 }
  0x24   :  { %188 = vmatpush3.msra.mxu0 %v44_v3  ;;  %202 = vmatpush3.msra.mxu1 %v44_v3  ;;  %p256_p0 = pnand %p255_p13, %p249_p10 }
  0x25   :  { %189 = vmatprep.mubr.msk.f32.mxu0 %vm48_vm0, %v40_v4  ;;  %192 = vmatprep.mubr.msk.f32.mxu1 %vm48_vm0, %v42_v5 }
  0x26   :  { %190 = vmatmul.mubr.msk.f32.vlgmr.msra.gmra.mxu0 %vm48_vm0, %v41_v6  ;;  %193 = vmatmul.mubr.msk.f32.vlgmr.msra.gmra.mxu1 %vm48_vm0, %v43_v7 }
  0xe6   :  { %v191_v8 = vpop.f32.mrf.mxu0  ;;  %v194_v9 = vpop.f32.mrf.mxu1 }
  0xe7   :  { %148 = vst.msk [vmem:[#allocation7 + $0x8] sm:$0xff] %vm146_vm1, %v191_v8  ;;  %150 = vst.msk [vmem:[#allocation7 + $0x18] sm:$0xff] %vm146_vm1, %v194_v9 }
  0xe8   :  { %v127_v10 = vpop.f32.mrf.mxu0  ;;  %v137_v11 = vpop.f32.mrf.mxu1 }
  0xe9   :  { %147 = vst.msk [vmem:[#allocation7] sm:$0xff] %vm146_vm1, %v127_v10  ;;  %149 = vst.msk [vmem:[#allocation7 + $0x10] sm:$0xff] %vm146_vm1, %v137_v11 }
  0xea   :  { %259 = shalt.err (!%p256_p0)
}
  0xeb   :  { %162 = dma.vmem_to_hbm [thread:$0]  %s157_s1, 512, %s314_s2, [#allocation4], %s275_s12, %s275_s12, %s276_s13  }
  0xec   :  { %272 = dma.done.wait [#allocation4], 512  }
  0xed   :  { %273 = vsyncadd [#allocation4], 4294966784 }
  0xee   :  { %166 = vsyncpa [#allocation3], 1 }
  0xef   :  { %167 = vsyncpa [#allocation6], 1 }
  0xf0   :  { %168 = vsyncpa [#allocation4], 1 }

</bundles_post_ra>
